<compile_context>
chip_gen: v7x
topology: tpu7x:2x2x1
jax: 0.10.0
libtpu: 0.0.40
codegen_flags: <defaults>
</compile_context>

<pallas_src>
import functools

import jax
import jax.numpy as jnp
from jax import lax
from jax.experimental import pallas as pl
from jax.experimental.pallas import tpu as pltpu


# ---------------------------------------------------------------------------
# K1: per-node precompute (gridded over row tiles).
# ---------------------------------------------------------------------------
def precompute_kernel(x_ref, emb_ref, w_ref,
                      att_i_ref, att_em_i_ref, att_j_ref, att_em_j_ref,
                      xl_ref, s_i_ref, s_j_ref, *, ones_col):
    # x [tm, C_in] f32, emb [tm, Dp] f32, w [C_in, Dp] bf16 (zero-padded cols)
    xl = jnp.dot(x_ref[...].astype(jnp.bfloat16), w_ref[...],
                 preferred_element_type=jnp.float32)            # [tm, Dp] f32 acc
    emb = emb_ref[...]
    # Per-node score halves (VPU/XLU reduces on the f32 accumulation).
    s_i_ref[...] = (jnp.sum(xl * att_i_ref[...], axis=-1, keepdims=True)
                    + jnp.sum(emb * att_em_i_ref[...], axis=-1, keepdims=True))
    s_j_ref[...] = (jnp.sum(xl * att_j_ref[...], axis=-1, keepdims=True)
                    + jnp.sum(emb * att_em_j_ref[...], axis=-1, keepdims=True))
    if ones_col is not None:
        # Spare padded lane <- 1.0 so K2's matmul also yields the softmax denom.
        col = lax.broadcasted_iota(jnp.int32, xl.shape, 1)
        xl = jnp.where(col == ones_col, 1.0, xl)
    xl_ref[...] = xl.astype(jnp.bfloat16)                        # MXU-native dtype


# ---------------------------------------------------------------------------
# K2: tiled masked softmax + aggregation (+ bias fold + BN partial stats).
# ---------------------------------------------------------------------------
def attention_agg_kernel(s_i_ref, adj_ref, s_j_ref, xl_ref, bias_ref,
                         y_ref, stats_ref, *, ones_col):
    # s_i [tm,1] f32, adj [tm,N] int8, s_j [1,N] f32 (resident),
    # xl [N,Dp] bf16 (resident), bias [1,Dp] f32 (resident)
    raw = s_i_ref[...] + s_j_ref[...]                            # [tm, N]
    lrelu = jnp.maximum(raw, jnp.float32(0.2) * raw)             # leaky_relu(0.2), 1 VPU op
    masked = jnp.where(adj_ref[...] != 0, lrelu, jnp.float32(-1e30))
    row_max = jnp.max(masked, axis=-1, keepdims=True)            # per-target max
    e = jnp.exp(masked - row_max).astype(jnp.bfloat16)           # masked lanes -> 0
    # Deferred normalization: aggregate unnormalized weights on the MXU.
    agg = jnp.dot(e, xl_ref[...], preferred_element_type=jnp.float32)  # [tm, Dp]
    if ones_col is not None:
        # Denominator from the MXU "ones" column (consistent with bf16 numerator).
        denom = agg[:, ones_col:ones_col + 1]
    else:
        denom = jnp.sum(e.astype(jnp.float32), axis=-1, keepdims=True)
    y = agg * pl.reciprocal(denom, approx=True) + bias_ref[...]
    y_ref[...] = y
    # BN partial stats for this row tile: sublane 0 = sum, sublane 1 = sum(y^2).
    s1 = jnp.sum(y, axis=0, keepdims=True)
    s2 = jnp.sum(y * y, axis=0, keepdims=True)
    row = lax.broadcasted_iota(jnp.int32, (8, y.shape[1]), 0)
    stats_ref[0] = jnp.where(row == 0, s1, jnp.where(row == 1, s2, jnp.float32(0.0)))


# ---------------------------------------------------------------------------
# K3: BatchNorm1d (training-mode batch stats) + ReLU, gridded over row tiles.
# ---------------------------------------------------------------------------
def bn_relu_kernel(y_ref, stats_ref, gamma_ref, beta_ref, out_ref, *, inv_n):
    total = jnp.sum(stats_ref[...], axis=0)                      # [8, Dp], tiny
    mean = total[0:1, :] * inv_n
    ex2 = total[1:2, :] * inv_n
    var = jnp.maximum(ex2 - mean * mean, jnp.float32(0.0))
    inv_std = lax.rsqrt(var + jnp.float32(1e-5))
    out_ref[...] = jnp.maximum(
        (y_ref[...] - mean) * (inv_std * gamma_ref[...]) + beta_ref[...],
        jnp.float32(0.0))


# ---------------------------------------------------------------------------
# Host-side helpers
# ---------------------------------------------------------------------------
def build_adjacency(edge_index, num_nodes):
    """remove_self_loops + add_self_loops as a dense int8 mask adj[i, j] = edge j->i.

    NOTE: the dense mask deduplicates parallel (j->i) edges; PyG scatter-softmax
    would count duplicates separately. Inputs here contain no duplicate edges.
    """
    src, tgt = edge_index[0], edge_index[1]
    keep = (src != tgt).astype(jnp.int8)
    adj = jnp.zeros((num_nodes, num_nodes), jnp.int8)
    adj = adj.at[tgt, src].set(keep)                  # drop original self loops
    idx = jnp.arange(num_nodes)
    adj = adj.at[idx, idx].set(jnp.int8(1))           # add self loops
    return adj


def _pad_lanes(a, dp):
    a = a.astype(jnp.float32)
    pad = dp - a.shape[-1]
    if pad == 0:
        return a
    return jnp.pad(a, ((0, 0), (0, pad)))


def _vmem_params():
    """Per-generation VMEM limit and tiling budget (v5e/v6e 128 MiB, v7x 64 MiB)."""
    try:
        cap = int(pltpu.get_tpu_info().vmem_capacity_bytes)
    except Exception:
        cap = 64 * 1024 * 1024                     # conservative fallback
    vlimit = max(32 * 1024 * 1024, min((cap * 3) // 4, cap - (16 << 20)))
    budget = vlimit // 2                           # solve the row tile against ~0.5x
    return vlimit, budget


def _pick_row_tile(n, dp, budget):
    """Largest multiple-of-32 row tile dividing n that fits the K2 live-bytes budget."""
    resident = n * dp * 2 + n * 4 + 4 * dp * 4           # xl bf16 + s_j + small params
    per_row = 4 * n * 4 + 2 * n + 2 * dp * 4             # ~4 f32 (tm,N) slabs + 2x int8 adj + 2x out
    tm_cap = max(32, ((budget - resident) // per_row // 32) * 32)
    if n <= tm_cap:
        return n
    t = min(tm_cap, (n // 32) * 32)
    while t >= 32:
        if n % t == 0:
            return t
        t -= 32
    return n                                             # no 32-multiple divisor: single tile


def gnn_layer_forward(x, edge_index, embedding, params, tm=None):
    N, _ = x.shape
    D = params["lin_w"].shape[0]
    Dp = -(-D // 128) * 128                       # lane-dense feature width (>=128)
    ones_col = D if D < Dp else None              # spare padded lane for the MXU denom

    vlimit, budget = _vmem_params()
    if tm is None:
        tm = _pick_row_tile(N, Dp, budget)
    assert N % tm == 0, "node count must be a multiple of the row tile"
    n_tiles = N // tm

    adj = build_adjacency(edge_index, N)                       # int8 [N, N]
    w_pad = _pad_lanes(params["lin_w"].T, Dp).astype(jnp.bfloat16)   # [C_in, Dp]
    emb_pad = _pad_lanes(embedding, Dp)                        # [N, Dp]
    att_i_p = _pad_lanes(params["att_i"], Dp)
    att_em_i_p = _pad_lanes(params["att_em_i"], Dp)
    att_j_p = _pad_lanes(params["att_j"], Dp)
    att_em_j_p = _pad_lanes(params["att_em_j"], Dp)
    bias_p = _pad_lanes(params["bias"], Dp)
    gamma_p = _pad_lanes(params["gamma"], Dp)
    beta_p = _pad_lanes(params["beta"], Dp)

    resident = pl.BlockSpec(memory_space=pltpu.MemorySpace.VMEM)   # single-copy, no pipeline bufs
    cparams = lambda sem: pltpu.CompilerParams(                    # noqa: E731
        dimension_semantics=sem, vmem_limit_bytes=vlimit)

    # --- K1: xl (bf16, padded, +ones column), per-node scores ---------------
    xl_bf16, s_i, s_j_col = pl.pallas_call(
        functools.partial(precompute_kernel, ones_col=ones_col),
        out_shape=(jax.ShapeDtypeStruct((N, Dp), jnp.bfloat16),
                   jax.ShapeDtypeStruct((N, 1), jnp.float32),
                   jax.ShapeDtypeStruct((N, 1), jnp.float32)),
        grid=(n_tiles,),
        in_specs=[
            pl.BlockSpec((tm, x.shape[1]), lambda i: (i, 0)),      # x row tile
            pl.BlockSpec((tm, Dp), lambda i: (i, 0)),              # emb row tile
            resident, resident, resident, resident, resident,      # w, att_*
        ],
        out_specs=(pl.BlockSpec((tm, Dp), lambda i: (i, 0)),
                   pl.BlockSpec((tm, 1), lambda i: (i, 0)),
                   pl.BlockSpec((tm, 1), lambda i: (i, 0))),
        compiler_params=cparams(("parallel",)),
    )(x.astype(jnp.float32), emb_pad, w_pad,
      att_i_p, att_em_i_p, att_j_p, att_em_j_p)

    s_j_row = s_j_col.reshape(1, N)               # tiny relayout; resident in K2

    # --- K2: tiled masked softmax + aggregation + bias + BN partials --------
    y, stats = pl.pallas_call(
        functools.partial(attention_agg_kernel, ones_col=ones_col),
        out_shape=(jax.ShapeDtypeStruct((N, Dp), jnp.float32),
                   jax.ShapeDtypeStruct((n_tiles, 8, Dp), jnp.float32)),
        grid=(n_tiles,),
        in_specs=[
            pl.BlockSpec((tm, 1), lambda i: (i, 0)),    # s_i row tile
            pl.BlockSpec((tm, N), lambda i: (i, 0)),    # int8 adjacency tile (pipelined DMA)
            resident,                                   # s_j (all sources)
            resident,                                   # xl  (all sources, bf16)
            resident,                                   # bias
        ],
        out_specs=(pl.BlockSpec((tm, Dp), lambda i: (i, 0)),
                   pl.BlockSpec((1, 8, Dp), lambda i: (i, 0, 0))),
        compiler_params=cparams(("parallel",)),
    )(s_i, adj, s_j_row, xl_bf16, bias_p)

    # --- K3: BatchNorm (training stats from K2 partials) + ReLU -------------
    out_pad = pl.pallas_call(
        functools.partial(bn_relu_kernel, inv_n=1.0 / float(N)),
        out_shape=jax.ShapeDtypeStruct((N, Dp), jnp.float32),
        grid=(n_tiles,),
        in_specs=[
            pl.BlockSpec((tm, Dp), lambda i: (i, 0)),   # y row tile
            resident,                                   # per-tile stats (tiny)
            resident,                                   # gamma
            resident,                                   # beta
        ],
        out_specs=pl.BlockSpec((tm, Dp), lambda i: (i, 0)),
        compiler_params=cparams(("parallel",)),
    )(y, stats, gamma_p, beta_p)

    return out_pad[:, :D]


# ---------------------------------------------------------------------------
# Pure-JAX edge-list reference (mirrors the PyTorch/PyG computation, f32).
# ---------------------------------------------------------------------------
def ref_forward(x, edge_index, embedding, params):
    N = x.shape[0]
    src, tgt = edge_index[0], edge_index[1]
    keep = src != tgt
    src, tgt = src[keep], tgt[keep]
    loops = jnp.arange(N)
    src = jnp.concatenate([src, loops])
    tgt = jnp.concatenate([tgt, loops])

    xl = x @ params["lin_w"].T
    emb = embedding
    s_i_node = (xl * params["att_i"]).sum(-1) + (emb * params["att_em_i"]).sum(-1)
    s_j_node = (xl * params["att_j"]).sum(-1) + (emb * params["att_em_j"]).sum(-1)
    a = s_i_node[tgt] + s_j_node[src]
    a = jnp.where(a >= 0, a, 0.2 * a)
    amax = jax.ops.segment_max(a, tgt, num_segments=N)
    e = jnp.exp(a - amax[tgt])
    denom = jax.ops.segment_sum(e, tgt, num_segments=N)
    alpha = e / denom[tgt]
    out = jax.ops.segment_sum(alpha[:, None] * xl[src], tgt, num_segments=N)
    out = out + params["bias"]
    mean = out.mean(0)
    var = ((out - mean) ** 2).mean(0)
    y = (out - mean) / jnp.sqrt(var + 1e-5) * params["gamma"] + params["beta"]
    return jnp.maximum(y, 0.0)


if __name__ == "__main__":
    N, C_IN, D = 128, 32, 32     # node_num, in_channel, out_channel (emb dim == D)
    TM = 32                      # small row tile so the demo exercises a multi-step grid

    key = jax.random.PRNGKey(0)
    k_x, k_emb, k_w, k_ai, k_aj, k_aei, k_aej = jax.random.split(key, 7)

    x = jax.random.normal(k_x, (N, C_IN), jnp.float32)
    embedding = jax.random.normal(k_emb, (N, D), jnp.float32)

    def glorot(k, shape):
        fan = shape[-1] + shape[-2] if len(shape) > 1 else shape[-1]
        s = (6.0 / fan) ** 0.5
        return jax.random.uniform(k, shape, jnp.float32, -s, s)

    params = {
        "lin_w":    glorot(k_w, (D, C_IN)),     # nn.Linear weight [out, in]
        "att_i":    glorot(k_ai, (1, D)),
        "att_j":    glorot(k_aj, (1, D)),
        "att_em_i": glorot(k_aei, (1, D)),
        "att_em_j": glorot(k_aej, (1, D)),
        "bias":     jnp.zeros((1, D), jnp.float32),
        "gamma":    jnp.ones((1, D), jnp.float32),
        "beta":     jnp.zeros((1, D), jnp.float32),
    }

    # Directed graph: each node i receives from (i+1)%N, (i+2)%N, (i+3)%N.
    tgt = jnp.repeat(jnp.arange(N), 3)
    src = ((jnp.arange(N)[:, None] + jnp.array([1, 2, 3])[None, :]) % N).reshape(-1)
    edge_index = jnp.stack([src, tgt]).astype(jnp.int32)    # [2, 3N]

    out = gnn_layer_forward(x, edge_index, embedding, params, tm=TM)
    out = jax.block_until_ready(out)

    ref = ref_forward(x, edge_index, embedding, params)
    assert out.shape == (N, D)
    # bf16 MXU inputs + approx reciprocal -> loosened tolerance vs the f32 reference.
    assert jnp.allclose(out, ref, atol=5e-2, rtol=5e-2), "mismatch vs reference"

    print("KERNEL_OK")
</pallas_src>

<mosaic_0001>
module attributes {stable_mosaic.version = 11 : i64} {
  func.func @precompute_kernel(%arg0: i32, %arg1: memref<32x32xf32, #tpu.memory_space<vmem>>, %arg2: memref<32x128xf32, #tpu.memory_space<vmem>>, %arg3: memref<32x128xbf16, #tpu.memory_space<vmem>>, %arg4: memref<1x128xf32, #tpu.memory_space<vmem>>, %arg5: memref<1x128xf32, #tpu.memory_space<vmem>>, %arg6: memref<1x128xf32, #tpu.memory_space<vmem>>, %arg7: memref<1x128xf32, #tpu.memory_space<vmem>>, %arg8: memref<32x128xbf16, #tpu.memory_space<vmem>>, %arg9: memref<32x1xf32, #tpu.memory_space<vmem>>, %arg10: memref<32x1xf32, #tpu.memory_space<vmem>>) attributes {dimension_semantics = [#tpu.dimension_semantics<parallel>], iteration_bounds = array<i64: 4>, scalar_prefetch = 0 : i64, scratch_operands = 0 : i64, tpu.core_type = #tpu.core_type<tc>, window_params = [{transform_indices = @transform_0, window_bounds = array<i64: 32, 32>}, {transform_indices = @transform_1, window_bounds = array<i64: 32, 128>}, {pipeline_mode = #tpu.pipeline_mode<synchronous>, transform_indices = @transform_2, window_bounds = array<i64: 32, 128>}, {pipeline_mode = #tpu.pipeline_mode<synchronous>, transform_indices = @transform_3, window_bounds = array<i64: 1, 128>}, {pipeline_mode = #tpu.pipeline_mode<synchronous>, transform_indices = @transform_4, window_bounds = array<i64: 1, 128>}, {pipeline_mode = #tpu.pipeline_mode<synchronous>, transform_indices = @transform_5, window_bounds = array<i64: 1, 128>}, {pipeline_mode = #tpu.pipeline_mode<synchronous>, transform_indices = @transform_6, window_bounds = array<i64: 1, 128>}, {transform_indices = @transform_7, window_bounds = array<i64: 32, 128>}, {transform_indices = @transform_8, window_bounds = array<i64: 32, 1>}, {transform_indices = @transform_9, window_bounds = array<i64: 32, 1>}]} {
    %c0 = arith.constant 0 : index
    %c0_0 = arith.constant 0 : index
    %0 = vector.load %arg1[%c0, %c0_0] : memref<32x32xf32, #tpu.memory_space<vmem>>, vector<32x32xf32>
    %1 = arith.truncf %0 : vector<32x32xf32> to vector<32x32xbf16>
    %c0_1 = arith.constant 0 : index
    %c0_2 = arith.constant 0 : index
    %2 = vector.load %arg3[%c0_1, %c0_2] : memref<32x128xbf16, #tpu.memory_space<vmem>>, vector<32x128xbf16>
    %cst = arith.constant dense<0.000000e+00> : vector<32x128xf32>
    %3 = tpu.matmul %1, %2, %cst {dimension_numbers = #tpu.dot_dimension_numbers<[1], [0], [0], [1], [0, 0, 1, 1], [], []>} : vector<32x32xbf16>, vector<32x128xbf16>, vector<32x128xf32> -> vector<32x128xf32>
    %c0_3 = arith.constant 0 : index
    %c0_4 = arith.constant 0 : index
    %4 = vector.load %arg2[%c0_3, %c0_4] : memref<32x128xf32, #tpu.memory_space<vmem>>, vector<32x128xf32>
    %c0_5 = arith.constant 0 : index
    %c0_6 = arith.constant 0 : index
    %5 = vector.load %arg4[%c0_5, %c0_6] : memref<1x128xf32, #tpu.memory_space<vmem>>, vector<1x128xf32>
    %6 = vector.broadcast %5 : vector<1x128xf32> to vector<32x128xf32>
    %7 = arith.mulf %3, %6 : vector<32x128xf32>
    %cst_7 = arith.constant dense<0.000000e+00> : vector<32xf32>
    %8 = vector.multi_reduction <add>, %7, %cst_7 [1] : vector<32x128xf32> to vector<32xf32>
    %9 = vector.shape_cast %8 : vector<32xf32> to vector<32x1xf32>
    %c0_8 = arith.constant 0 : index
    %c0_9 = arith.constant 0 : index
    %10 = vector.load %arg5[%c0_8, %c0_9] : memref<1x128xf32, #tpu.memory_space<vmem>>, vector<1x128xf32>
    %11 = vector.broadcast %10 : vector<1x128xf32> to vector<32x128xf32>
    %12 = arith.mulf %4, %11 : vector<32x128xf32>
    %cst_10 = arith.constant dense<0.000000e+00> : vector<32xf32>
    %13 = vector.multi_reduction <add>, %12, %cst_10 [1] : vector<32x128xf32> to vector<32xf32>
    %14 = vector.shape_cast %13 : vector<32xf32> to vector<32x1xf32>
    %15 = arith.addf %9, %14 : vector<32x1xf32>
    %c0_11 = arith.constant 0 : index
    %c0_12 = arith.constant 0 : index
    %16 = vector.load %arg9[%c0_11, %c0_12] : memref<32x1xf32, #tpu.memory_space<vmem>>, vector<32x1xf32>
    tpu.vector_store %arg9[%c0_11, %c0_12], %15 {strides = array<i32>} : memref<32x1xf32, #tpu.memory_space<vmem>>, vector<32x1xf32>,
    %c0_13 = arith.constant 0 : index
    %c0_14 = arith.constant 0 : index
    %17 = vector.load %arg6[%c0_13, %c0_14] : memref<1x128xf32, #tpu.memory_space<vmem>>, vector<1x128xf32>
    %18 = vector.broadcast %17 : vector<1x128xf32> to vector<32x128xf32>
    %19 = arith.mulf %3, %18 : vector<32x128xf32>
    %cst_15 = arith.constant dense<0.000000e+00> : vector<32xf32>
    %20 = vector.multi_reduction <add>, %19, %cst_15 [1] : vector<32x128xf32> to vector<32xf32>
    %21 = vector.shape_cast %20 : vector<32xf32> to vector<32x1xf32>
    %c0_16 = arith.constant 0 : index
    %c0_17 = arith.constant 0 : index
    %22 = vector.load %arg7[%c0_16, %c0_17] : memref<1x128xf32, #tpu.memory_space<vmem>>, vector<1x128xf32>
    %23 = vector.broadcast %22 : vector<1x128xf32> to vector<32x128xf32>
    %24 = arith.mulf %4, %23 : vector<32x128xf32>
    %cst_18 = arith.constant dense<0.000000e+00> : vector<32xf32>
    %25 = vector.multi_reduction <add>, %24, %cst_18 [1] : vector<32x128xf32> to vector<32xf32>
    %26 = vector.shape_cast %25 : vector<32xf32> to vector<32x1xf32>
    %27 = arith.addf %21, %26 : vector<32x1xf32>
    %c0_19 = arith.constant 0 : index
    %c0_20 = arith.constant 0 : index
    %28 = vector.load %arg10[%c0_19, %c0_20] : memref<32x1xf32, #tpu.memory_space<vmem>>, vector<32x1xf32>
    tpu.vector_store %arg10[%c0_19, %c0_20], %27 {strides = array<i32>} : memref<32x1xf32, #tpu.memory_space<vmem>>, vector<32x1xf32>,
    %29 = tpu.iota {dimensions = array<i32: 1>} : vector<32x128xi32>
    %c32_i32 = arith.constant 32 : i32
    %30 = vector.broadcast %c32_i32 : i32 to vector<32x128xi32>
    %31 = arith.cmpi eq, %29, %30 : vector<32x128xi32>
    %cst_21 = arith.constant 1.000000e+00 : f32
    %32 = vector.broadcast %cst_21 : f32 to vector<32x128xf32>
    %33 = arith.select %31, %32, %3 : vector<32x128xi1>, vector<32x128xf32>
    %34 = arith.truncf %33 : vector<32x128xf32> to vector<32x128xbf16>
    %c0_22 = arith.constant 0 : index
    %c0_23 = arith.constant 0 : index
    %35 = vector.load %arg8[%c0_22, %c0_23] : memref<32x128xbf16, #tpu.memory_space<vmem>>, vector<32x128xbf16>
    tpu.vector_store %arg8[%c0_22, %c0_23], %34 {strides = array<i32>} : memref<32x128xbf16, #tpu.memory_space<vmem>>, vector<32x128xbf16>,
    return
  }
  func.func @transform_0(%arg0: i32) -> (i32, i32) {
    %c0_i32 = arith.constant 0 : i32
    %c0_i32_0 = arith.constant 0 : i32
    return %arg0, %c0_i32 : i32, i32
  }
  func.func @transform_1(%arg0: i32) -> (i32, i32) {
    %c0_i32 = arith.constant 0 : i32
    %c0_i32_0 = arith.constant 0 : i32
    return %arg0, %c0_i32 : i32, i32
  }
  func.func @transform_2(%arg0: i32) -> (i32, i32) {
    %c0_i32 = arith.constant 0 : i32
    %c0_i32_0 = arith.constant 0 : i32
    %c0_i32_1 = arith.constant 0 : i32
    return %c0_i32, %c0_i32_0 : i32, i32
  }
  func.func @transform_3(%arg0: i32) -> (i32, i32) {
    %c0_i32 = arith.constant 0 : i32
    %c0_i32_0 = arith.constant 0 : i32
    %c0_i32_1 = arith.constant 0 : i32
    return %c0_i32, %c0_i32_0 : i32, i32
  }
  func.func @transform_4(%arg0: i32) -> (i32, i32) {
    %c0_i32 = arith.constant 0 : i32
    %c0_i32_0 = arith.constant 0 : i32
    %c0_i32_1 = arith.constant 0 : i32
    return %c0_i32, %c0_i32_0 : i32, i32
  }
  func.func @transform_5(%arg0: i32) -> (i32, i32) {
    %c0_i32 = arith.constant 0 : i32
    %c0_i32_0 = arith.constant 0 : i32
    %c0_i32_1 = arith.constant 0 : i32
    return %c0_i32, %c0_i32_0 : i32, i32
  }
  func.func @transform_6(%arg0: i32) -> (i32, i32) {
    %c0_i32 = arith.constant 0 : i32
    %c0_i32_0 = arith.constant 0 : i32
    %c0_i32_1 = arith.constant 0 : i32
    return %c0_i32, %c0_i32_0 : i32, i32
  }
  func.func @transform_7(%arg0: i32) -> (i32, i32) {
    %c0_i32 = arith.constant 0 : i32
    %c0_i32_0 = arith.constant 0 : i32
    return %arg0, %c0_i32 : i32, i32
  }
  func.func @transform_8(%arg0: i32) -> (i32, i32) {
    %c0_i32 = arith.constant 0 : i32
    %c0_i32_0 = arith.constant 0 : i32
    return %arg0, %c0_i32 : i32, i32
  }
  func.func @transform_9(%arg0: i32) -> (i32, i32) {
    %c0_i32 = arith.constant 0 : i32
    %c0_i32_0 = arith.constant 0 : i32
    return %arg0, %c0_i32 : i32, i32
  }
}

</mosaic_0001>

<bundles_post_ra>
// kernel: tpu_custom_call.1
= control target key start
LH: loop header
LB: loop body
LE: loop exit
PB: predicated region body
PF: predicated region fallthrough
CT: control target
= control target key end

     0   :  { %15 = vsyncpa [#allocation3], 0  ;;  %s1107_s0 = inlined_call_operand.vmem [shape: f32[128,32], index: 0, kind: input, shape index: {}]   ;;  %s1108_s1 = inlined_call_operand.vmem [shape: f32[128,128], index: 1, kind: input, shape index: {}]   ;;  %s1109_s2 = inlined_call_operand.vmem [shape: bf16[32,128], index: 2, kind: input, shape index: {}]   ;;  %s1110_s3 = inlined_call_operand.vmem [shape: f32[1,128], index: 3, kind: input, shape index: {}]   ;;  %s1111_s4 = inlined_call_operand.vmem [shape: f32[1,128], index: 4, kind: input, shape index: {}]   ;;  %s1112_s5 = inlined_call_operand.vmem [shape: f32[1,128], index: 5, kind: input, shape index: {}]   ;;  %s1113_s6 = inlined_call_operand.vmem [shape: f32[1,128], index: 6, kind: input, shape index: {}]   ;;  %s1114_s7 = inlined_call_operand.hbm [shape: bf16[128,128], index: 7, kind: output, shape index: {0}]   ;;  %s1115_s8 = inlined_call_operand.vmem [shape: f32[128,1], index: 8, kind: output, shape index: {1}]   ;;  %s1116_s9 = inlined_call_operand.vmem [shape: f32[128,1], index: 9, kind: output, shape index: {2}]  }
   0x1   :  { %17 = vsyncpa [#allocation3 + $0x1], 0  ;;  %s960_s30 = smov 0   ;;  %s962_s10 = smov 0  }
   0x2   :  { %s964_s11 = smov 0   ;;  %s966_s12 = smov 0  }
   0x3 LB: > { %s981_s13 = sadd.s32 4294967295, %s905_s12   ;;  %s742_s14 = sadd.s32 4294967294, %s905_s12   ;;  %s905_s12 = sphi %s966_s12, %s1122_s12   ;;  %s901_s11 = sphi %s964_s11, %s1121_s11   ;;  %s897_s10 = sphi %s962_s10, %s1120_s10   ;;  %s893_s30 = sphi %s960_s30, %s1119_s30  }
   0x4   : > { %s985_s15 = sadd.s32 1, %s905_s12   ;;  %s187_s16 = sadd.s32 1, %s901_s11 }
   0x5   : > { %s184_s17 = ssub.s32 %s905_s12, %s985_s15  ;;  %p197_p0 = scmp.ne.s32.totalorder %s901_s11, %s897_s10 }
   0x6   : > { %p185_p1 = scmp.eq.s32.totalorder %s184_s17, 0  ;;  %p198_p2 = scmp.eq.s32.totalorder %s981_s13, 3 }
   0x7   : > { %p203_p3 = scmp.ne.s32.totalorder %s897_s10, %s893_s30  ;;  %p204_p4 = scmp.eq.s32.totalorder %s742_s14, 3 }
   0x8   : > { %s996_s18 = scalar_select %p185_p1, %s901_s11, %s187_s16  }
   0x9   : > { %p998_p5 = por %p198_p2, %p197_p0  ;;  %p1002_p6 = por %p204_p4, %p203_p3 }
   0xa   : > { %p745_p7 = scmp.ge.s32.totalorder %s905_s12, 1  ;;  %p307_p8 = scmp.lt.s32.totalorder %s905_s12, 5 }
   0xc   : > { %p308_p9 = pnand %p745_p7, %p307_p8 }
   0xd   : > { %v841_v0 = vld [vmem:[%s1109_s2] sm:$0xff] (!%p308_p9)   ;;  %s747_s23 = sshll.u32 (!%p308_p9), %s981_s13, 2  ;;  %v842_v1 = vld [vmem:[%s1109_s2 + $0x8] sm:$0xff] (!%p308_p9)   ;;  %vm406_vm0 = vcmask (!%p308_p9), 261120   ;;  %v559_v20 = vlaneseq (!%p308_p9)  ;;  %s341_s25 = sand.u32 (!%p308_p9), 1, %s897_s10  }
   0xe   : > { %311 = sbr.rel (%p308_p9) target bundleno = 403 (0x193), region = 48  ;;  %p359_p10 = scmp.lt.s32.totalorder (!%p308_p9), %s747_s23, 15  ;;  %792 = vmatprep.subr.bf16.mxu0 (!%p308_p9), %v841_v0  ;;  %v760_v2 = vld [vmem:[%s1111_s4] ss:$0 sm:$0xff] (!%p308_p9) }
   0xf   : > { %793 = vmatpush3.bf16.msra.mxu0 (!%p308_p9), %v841_v0  ;;  %v762_v17 = vld [vmem:[%s1113_s6] ss:$0 sm:$0xff] (!%p308_p9)  ;;  %v560_v21 = vand.u32 (!%p308_p9), 127, %v559_v20  ;;  %s746_s16 = sshll.u32 (!%p308_p9), %s341_s25, 4  ;;  %s776_s22 = sshll.u32 (!%p308_p9), %s981_s13, 8 }
  0x10   : > { %794 = vmatprep.subr.bf16.mxu0 (!%p308_p9), %v842_v1  ;;  %v761_v22 = vld [vmem:[%s1112_s5] ss:$0 sm:$0xff] (!%p308_p9)  ;;  %s1046_s27 = scalar_lea.hbm (!%p308_p9), %s1114_s7, %s776_s22  ;;  %s1050_s28 = scalar_lea.sflag (!%p308_p9), [#allocation3], %s341_s25 }
  0x11   : > { %v759_v23 = vld [vmem:[%s1110_s3] ss:$0 sm:$0xff] (!%p308_p9)  ;;  %vm561_vm1 = vcmp.eq.s32.totalorder (!%p308_p9), %v560_v21, 32  ;;  %s907_s14 = smov (!%p308_p9), [#allocation2]  }
  0x13   : > { %795 = vmatpush3.bf16.msra.mxu0 (!%p308_p9), %v842_v1 }
  0x15   : > { %s1124_s23 = smov (!%p359_p10, %s747_s23), 15 }
  0x16   : > { %s1015_s26 = sshll.u32 %s1124_s23, 3 }
  0x17   : > { %s362_s29 = scalar_lea.vmem %s1107_s0, %s1015_s26  ;;  %s368_s17 = scalar_lea.vmem %s1108_s1, %s1015_s26 }
  0x18   : > { %v384_v3 = vld [vmem:[%s362_s29] sm:$0xff]  ;;  %v385_v4 = vld [vmem:[%s362_s29 + $0x8] sm:$0xff]  ;;  %v386_v5 = vld [vmem:[%s362_s29 + $0x10] sm:$0xff] }
  0x19   : > { %v388_v6 = vpack.c.bf16 %v385_v4, %v384_v3  ;;  %v387_v7 = vld [vmem:[%s362_s29 + $0x18] sm:$0xff]  ;;  %v463_v8 = vld [vmem:[%s368_s17 + $0x8] sm:$0xff]  ;;  %v462_v9 = vld [vmem:[%s368_s17] sm:$0xff] }
  0x1a   : > { %v389_v10 = vpack.c.bf16 %v387_v7, %v386_v5  ;;  %v493_v11 = vmul.f32 %v760_v2, %v463_v8  ;;  %v492_v12 = vmul.f32 %v760_v2, %v462_v9  ;;  %v465_v13 = vld [vmem:[%s368_s17 + $0x18] sm:$0xff]  ;;  %v464_v14 = vld [vmem:[%s368_s17 + $0x10] sm:$0xff]  ;;  %v540_v18 = vmul.f32 %v762_v17, %v463_v8  ;;  %s343_s17 = scalar_lea.vmem [#allocation2], %s746_s16  ;;  %s847_s16 = sshll.u32 %s907_s14, 4  ;;  %s848_s16 = int_to_ptr.vmem [resolvable:$false] %s847_s16 }
  0x1b   : > { %796 = vmatprep.mubr.msk.bf16.mxu0 %vm406_vm0, %v388_v6  ;;  %v495_v15 = vmul.f32 %v760_v2, %v465_v13  ;;  %v494_v16 = vmul.f32 %v760_v2, %v464_v14  ;;  %v539_v19 = vmul.f32 %v762_v17, %v462_v9  ;;  %v542_v42 = vmul.f32 %v762_v17, %v465_v13  ;;  %s610_s21 = sshll.u32 %s343_s17, 4  ;;  %s1040_s21 = int_to_ptr.vmem [resolvable:$true] %s610_s21 }
  0x1c   : > { %797 = vmatmul.mubr.msk.bf16.vlgmr.msra.gmra.mrb[0].mxu0 %vm406_vm0, %v389_v10  ;;  %498 = vadd.xlane.f32.xlu1 %v493_v11  ;;  %v541_v43 = vmul.f32 %v762_v17, %v464_v14  ;;  %s843_s29 = scalar_lea.vmem %s1040_s21, 256  ;;  %p850_p0 = scmp.lt.s32.totalorder %s1040_s21, %s848_s16 }
  0x1d   : > { %496 = vadd.xlane.f32.xlu0 %v492_v12  ;;  %p844_p11 = scmp.ne.s32.totalorder %s1040_s21, %s843_s29 }
  0x1f   : > { %p845_p12 = pnand %p844_p11, %p998_p5 }
  0x20   : > { %502 = vadd.xlane.f32.xlu1 %v495_v15 }
  0x21   : > { %500 = vadd.xlane.f32.xlu0 %v494_v16  ;;  %p846_p13 = pneg %p845_p12 }
  0x24   : > { %545 = vadd.xlane.f32.xlu1 %v540_v18 }
  0x25   : > { %543 = vadd.xlane.f32.xlu0 %v539_v19 }
  0xef   : > { %v798_v24 = vpop.f32.mrb[0].mxu0 }
  0xf0   : > { %v447_v25 = vpop.f32.mrb[1].mxu0  ;;  %v522_v26 = vmul.f32 %v798_v24, %v761_v22  ;;  %v475_v27 = vmul.f32 %v798_v24, %v759_v23  ;;  %v564_v29 = vsel %vm561_vm1, 1.0, %v798_v24 }
  0xf1   : > { %v799_v28 = vpop.f32.mrb[2].mxu0  ;;  %v562_v32 = vsel %vm561_vm1, 1.0, %v447_v25  ;;  %v473_v36 = vmul.f32 %v759_v23, %v447_v25  ;;  %v520_v38 = vmul.f32 %v761_v22, %v447_v25 }
  0xf2   : > { %v565_v30 = vsel %vm561_vm1, 1.0, %v799_v28  ;;  %528 = vadd.xlane.f32.xlu0 %v522_v26  ;;  %481 = vadd.xlane.f32.xlu1 %v475_v27  ;;  %v450_v31 = vpop.f32.mrb[3].mxu0  ;;  %v476_v37 = vmul.f32 %v799_v28, %v759_v23  ;;  %v523_v39 = vmul.f32 %v799_v28, %v761_v22 }
  0xf3   : > { %v785_v33 = vpack.c.bf16 %v565_v30, %v564_v29  ;;  %v563_v34 = vsel %vm561_vm1, 1.0, %v450_v31  ;;  %v521_v40 = vmul.f32 %v761_v22, %v450_v31  ;;  %v474_v41 = vmul.f32 %v759_v23, %v450_v31 }
  0xf4   : > { %v780_v35 = vpack.c.bf16 %v563_v34, %v562_v32 }
  0xf5   : > { %787 = vst [vmem:[%s343_s17 + $0x8] sm:$0xff] %v785_v33  }
  0xf6   : > { %781 = vst [vmem:[%s343_s17] sm:$0xff] %v780_v35   ;;  %477 = vadd.xlane.f32.xlu0 %v473_v36  ;;  %483 = vadd.xlane.f32.xlu1 %v476_v37  ;;  %s849_s17 = scalar_lea.vmem %s848_s16, 512 }
  0xf7   : > { %p851_p1 = scmp.lt.s32.totalorder %s849_s17, %s843_s29 }
  0xf9   : > { %p852_p2 = por %p851_p1, %p850_p0 }
  0xfa   : > { %524 = vadd.xlane.f32.xlu0 %v520_v38  ;;  %530 = vadd.xlane.f32.xlu1 %v523_v39 }
  0xfb   : > { %p853_p3 = pnand %p852_p2, %p846_p13 }
  0xfe   : > { %526 = vadd.xlane.f32.xlu1 %v521_v40  ;;  %479 = vadd.xlane.f32.xlu0 %v474_v41 }
 0x102   : > { %549 = vadd.xlane.f32.xlu1 %v542_v42  ;;  %547 = vadd.xlane.f32.xlu0 %v541_v43 }
 0x103   : > { %856 = shalt.err (!%p853_p3)
}
 0x104   : > { %s857_s13 = scalar_lea.hbm %s1046_s27, 256  ;;  %s861_s23 = scalar_lea.hbm %s1114_s7, 1024 }
 0x105   : > { %p858_p4 = scmp.ne.s32.totalorder %s1046_s27, %s857_s13  ;;  %p862_p9 = scmp.lt.u32.totalorder %s1046_s27, %s1114_s7 }
 0x106   : > { %p863_p10 = scmp.lt.u32.totalorder %s861_s23, %s857_s13  ;;  %p865_p12 = scmp.lt.u32.totalorder %s857_s13, %s1046_s27 }
 0x107   : > { %p859_p7 = pnand %p858_p4, %p998_p5 }
 0x108   : > { %p864_p11 = por %p863_p10, %p862_p9 }
 0x109   : > { %p860_p8 = pneg %p859_p7 }
 0x10a   : > { %p866_p13 = por %p865_p12, %p864_p11 }
 0x10c   : > { %p867_p0 = pnand %p866_p13, %p860_p8 }
 0x10e   : > { %870 = shalt.err (!%p867_p0)
}
 0x10f   : > { %s908_s29 = smov 64   ;;  %s909_s16 = smov 4   ;;  %v499_v44 = vpop.xlane.xlu1 %498  ;;  %v497_v45 = vpop.xlane.xlu0 %496  ;;  %vm508_vm2 = vcmask 7168  }
 0x110   : > { %800 = dma.vmem_to_hbm [thread:$0]  (%p998_p5), %s1040_s21, 256, %s1046_s27, %s1050_s28, %s908_s29, %s908_s29, %s909_s16  }
 0x111   : > { %s375_s25 = scalar_lea.vmem %s1115_s8, %s1015_s26  ;;  %s381_s27 = scalar_lea.vmem %s1116_s9, %s1015_s26 }
 0x113   : > { %v503_v46 = vpop.xlane.xlu1 %502  ;;  %v501_v47 = vpop.xlane.xlu0 %500 }
 0x117   : > { %v546_v48 = vpop.xlane.xlu1 %545  ;;  %v544_v49 = vpop.xlane.xlu0 %543 }
 0x17f   : > { %v529_v50 = vpop.xlane.xlu0 %528  ;;  %v482_v51 = vpop.xlane.xlu1 %481 }
 0x180   : > { %v506_v52 = vadd.f32 %v501_v47, %v482_v51 }
 0x182   : > { %511 = vst.msk [vmem:[%s375_s25 + $0x10] sm:$0xff] %vm508_vm2, %v506_v52 }
 0x183   : > { %v478_v53 = vpop.xlane.xlu0 %477  ;;  %v484_v54 = vpop.xlane.xlu1 %483 }
 0x184   : > { %v504_v55 = vadd.f32 %v497_v45, %v478_v53  ;;  %v507_v56 = vadd.f32 %v503_v46, %v484_v54 }
 0x186   : > { %509 = vst.msk [vmem:[%s375_s25] sm:$0xff] %vm508_vm2, %v504_v55  ;;  %512 = vst.msk [vmem:[%s375_s25 + $0x18] sm:$0xff] %vm508_vm2, %v507_v56 }
 0x187   : > { %v525_v57 = vpop.xlane.xlu0 %524  ;;  %v531_v58 = vpop.xlane.xlu1 %530 }
 0x188   : > { %v551_v59 = vadd.f32 %v544_v49, %v525_v57 }
 0x18a   : > { %555 = vst.msk [vmem:[%s381_s27] sm:$0xff] %vm508_vm2, %v551_v59 }
 0x18b   : > { %v527_v60 = vpop.xlane.xlu1 %526  ;;  %v480_v61 = vpop.xlane.xlu0 %479 }
 0x18c   : > { %v552_v62 = vadd.f32 %v546_v48, %v527_v60  ;;  %v505_v63 = vadd.f32 %v499_v44, %v480_v61 }
 0x18e   : > { %556 = vst.msk [vmem:[%s381_s27 + $0x8] sm:$0xff] %vm508_vm2, %v552_v62  ;;  %510 = vst.msk [vmem:[%s375_s25 + $0x8] sm:$0xff] %vm508_vm2, %v505_v63 }
 0x18f   : > { %v550_v0 = vpop.xlane.xlu1 %549  ;;  %v548_v1 = vpop.xlane.xlu0 %547 }
 0x190   : > { %v554_v2 = vadd.f32 %v550_v0, %v531_v58  ;;  %v553_v3 = vadd.f32 %v548_v1, %v529_v50 }
 0x192   : > { %558 = vst.msk [vmem:[%s381_s27 + $0x18] sm:$0xff] %vm508_vm2, %v554_v2  ;;  %557 = vst.msk [vmem:[%s381_s27 + $0x10] sm:$0xff] %vm508_vm2, %v553_v3 }
 0x193 PF: > { %p806_p5 = scmp.ge.s32.totalorder %s905_s12, 2  ;;  %s633_s26 = sand.u32 1, %s893_s30  }
 0x194   : > { %s634_s28 = scalar_lea.sflag [#allocation3], %s633_s26 }
 0x195   : > { %p803_p1 = pnand %p806_p5, %p1002_p6 }
 0x197   : > { %888 = dma.done.wait (!%p803_p1), %s634_s28, 256  }
 0x198   : > { %890 = vsyncadd (!%p803_p1), %s634_s28, 4294967040  ;;  %p20_p2 = scmp.ge.s32.totalorder %s985_s15, 6   ;;  %s1119_s30 = smov %s897_s10 }
 0x199   : > { %s1120_s10 = smov %s901_s11  ;;  %s1121_s11 = smov %s996_s18 }
 0x19a   : > { %s1122_s12 = smov %s985_s15  ;;  %22 = sbr.rel (!%p20_p2) target bundleno = 3 (0x3), region = 110 }
 0x1a1   :  { %655 = vsyncpa [#allocation3], 1 }
 0x1a2   :  { %657 = vsyncpa [#allocation3 + $0x1], 1 }

</bundles_post_ra>
